<compile_context>
chip_gen: v7x
topology: tpu7x:2x2x1
jax: 0.10.0
libtpu: 0.0.40
codegen_flags: <defaults>
</compile_context>

<pallas_src>
import functools
import math

import jax
import jax.numpy as jnp
from jax.experimental import pallas as pl
from jax.experimental.pallas import tpu as pltpu


# ~2 MiB per pipeline buffer keeps 2 inputs x 2 double-buffers (~8 MiB) well
# inside the default scoped VMEM limits on v5e (16 MiB), v6e (32 MiB) and
# v7x (32 MiB scoped / 64 MiB physical).
_TARGET_BUF_BYTES = 2 * 1024 * 1024
_MAX_TILE_BC = 256


def _choose_tiles(bc, hw, itemsize, tile_bc=None, tile_hw=None):
    """Pick (TBC, THW) tile sizes respecting the (8, 128) layout rules."""
    if tile_bc is None:
        # Full BC block when small (block dim == full dim is always legal);
        # otherwise a multiple-of-8 tile (partial last block is fine: OOB
        # output rows are dropped, and rows are independent).
        tile_bc = bc if bc <= _MAX_TILE_BC else _MAX_TILE_BC
    tile_bc = min(tile_bc, bc)

    if tile_hw is None:
        target_elems = max(128, _TARGET_BUF_BYTES // max(int(itemsize), 1))
        tile_hw = max(128, (target_elems // max(tile_bc, 1)) // 128 * 128)
    if hw <= tile_hw:
        tile_hw = hw  # single HW block; block dim == full dim is legal.
    return tile_bc, tile_hw


def _dice_kernel(g_ref, p_ref, o_ref, num_acc, den_acc, *,
                 use_square, coeff_type, logit_threshold, epsilon,
                 hw_total, tile_hw, mask_cols):
    k = pl.program_id(1)

    @pl.when(k == 0)
    def _():
        num_acc[...] = jnp.zeros_like(num_acc)
        den_acc[...] = jnp.zeros_like(den_acc)

    g = g_ref[...].astype(jnp.float32)   # (TBC, THW)
    p = p_ref[...].astype(jnp.float32)   # (TBC, THW)

    if coeff_type == "hard":
        # sigmoid(p) > t  <=>  p > logit(t): one VPU compare, no EUP sigmoid.
        p = (p > logit_threshold).astype(jnp.float32)

    if mask_cols:
        # Last HW block overflows the array; zero the unspecified columns.
        col = jax.lax.broadcasted_iota(jnp.int32, g.shape, 1) + k * tile_hw
        valid = col < hw_total
        g = jnp.where(valid, g, 0.0)
        p = jnp.where(valid, p, 0.0)

    num_acc[...] += jnp.sum(p * g, axis=1, keepdims=True)
    if use_square:
        den_acc[...] += jnp.sum(p * p + g * g, axis=1, keepdims=True)
    else:
        den_acc[...] += jnp.sum(p + g, axis=1, keepdims=True)

    @pl.when(k == pl.num_programs(1) - 1)
    def _():
        o_ref[...] = (2.0 * num_acc[...] + epsilon) / (den_acc[...] + epsilon)


def dice_coeff(ground, prediction, *, act_as_loss=True, use_square=True,
               coeff_type="soft", threshold=0.5, epsilon=1e-6,
               _tile_bc=None, _tile_hw=None):
    """Pallas implementation of Dice_coeff.forward.

    ground, prediction: (B, C, *spatial) arrays (NCHW like the PyTorch
    module).  Returns a float32 scalar.
    """
    assert ground.shape == prediction.shape
    B, C = ground.shape[0], ground.shape[1]
    bc = B * C
    hw = 1
    for s in ground.shape[2:]:
        hw *= s

    # Keep inputs in their HBM dtype (bf16 stays bf16); cast inside the kernel.
    g2d = ground.reshape(bc, hw)
    p2d = prediction.reshape(bc, hw)

    itemsize = max(g2d.dtype.itemsize, p2d.dtype.itemsize)
    tile_bc, tile_hw = _choose_tiles(bc, hw, itemsize, _tile_bc, _tile_hw)
    nbc = pl.cdiv(bc, tile_bc)
    nhw = pl.cdiv(hw, tile_hw)
    mask_cols = (hw % tile_hw) != 0

    if coeff_type == "hard":
        # Precompute logit(threshold) statically (threshold expected in (0,1)).
        logit_threshold = math.log(threshold / (1.0 - threshold))
    else:
        logit_threshold = 0.0

    kernel = functools.partial(
        _dice_kernel,
        use_square=use_square,
        coeff_type=coeff_type,
        logit_threshold=logit_threshold,
        epsilon=epsilon,
        hw_total=hw,
        tile_hw=tile_hw,
        mask_cols=mask_cols,
    )

    bytes_accessed = (g2d.size * g2d.dtype.itemsize
                      + p2d.size * p2d.dtype.itemsize
                      + bc * 4)

    per_row_dice = pl.pallas_call(
        kernel,
        out_shape=jax.ShapeDtypeStruct((bc, 1), jnp.float32),
        grid_spec=pltpu.PrefetchScalarGridSpec(
            num_scalar_prefetch=0,
            grid=(nbc, nhw),
            in_specs=[
                pl.BlockSpec((tile_bc, tile_hw), lambda i, k: (i, k)),
                pl.BlockSpec((tile_bc, tile_hw), lambda i, k: (i, k)),
            ],
            out_specs=pl.BlockSpec((tile_bc, 1), lambda i, k: (i, 0)),
            scratch_shapes=[
                pltpu.VMEM((tile_bc, 1), jnp.float32),
                pltpu.VMEM((tile_bc, 1), jnp.float32),
            ],
        ),
        compiler_params=pltpu.CompilerParams(
            dimension_semantics=("parallel", "arbitrary")),
        cost_estimate=pl.CostEstimate(
            flops=5 * bc * hw, transcendentals=0,
            bytes_accessed=bytes_accessed),
    )(g2d, p2d)

    # Tiny epilogue over B*C scalars (mean + optional "1 - dice").
    dice_score = jnp.mean(per_row_dice[:, 0])
    if act_as_loss:
        return (1.0 - dice_score).astype(jnp.float32)
    return dice_score.astype(jnp.float32)


def _ref_dice(ground, prediction, *, act_as_loss=True, use_square=True,
              coeff_type="soft", threshold=0.5, epsilon=1e-6):
    """Pure-JAX reference mirroring the PyTorch module."""
    p = prediction
    if coeff_type == "hard":
        p = jax.nn.sigmoid(p)
        p = (p > threshold).astype(jnp.float32)
    axes = tuple(range(2, prediction.ndim))
    num = 2.0 * jnp.sum(p * ground, axis=axes)
    if use_square:
        den = jnp.sum(p * p + ground * ground, axis=axes)
    else:
        den = jnp.sum(p + ground, axis=axes)
    score = jnp.mean((num + epsilon) / (den + epsilon))
    return 1.0 - score if act_as_loss else score


if __name__ == "__main__":
    key = jax.random.PRNGKey(0)
    kg, kp, kg2, kp2 = jax.random.split(key, 4)

    # --- Test 1: default soft dice loss, small NCHW shape ------------------
    B, C, H, W = 2, 4, 16, 16
    ground = (jax.random.uniform(kg, (B, C, H, W)) > 0.5).astype(jnp.float32)
    prediction = jax.random.uniform(kp, (B, C, H, W), dtype=jnp.float32)

    loss = jax.block_until_ready(dice_coeff(ground, prediction))
    ref = _ref_dice(ground, prediction)
    assert jnp.allclose(loss, ref, atol=1e-5, rtol=1e-5), (loss, ref)

    # --- Test 2: "hard" coefficient (logit-threshold fast path) ------------
    logits = jax.random.normal(kp2, (B, C, H, W), dtype=jnp.float32)
    loss_h = jax.block_until_ready(
        dice_coeff(ground, logits, coeff_type="hard", act_as_loss=False))
    ref_h = _ref_dice(ground, logits, coeff_type="hard", act_as_loss=False)
    assert jnp.allclose(loss_h, ref_h, atol=1e-5, rtol=1e-5), (loss_h, ref_h)

    # --- Test 3: forced small tiles -> exercises partial BC block (OOB output
    # rows dropped) and partial HW block (in-kernel column masking). ---------
    B3, C3, H3, W3 = 3, 4, 16, 18          # bc=12, hw=288
    g3 = (jax.random.uniform(kg2, (B3, C3, H3, W3)) > 0.5).astype(jnp.float32)
    p3 = jax.random.uniform(kp, (B3, C3, H3, W3), dtype=jnp.float32)
    loss3 = jax.block_until_ready(
        dice_coeff(g3, p3, use_square=False, _tile_bc=8, _tile_hw=128))
    ref3 = _ref_dice(g3, p3, use_square=False)
    assert jnp.allclose(loss3, ref3, atol=1e-5, rtol=1e-5), (loss3, ref3)

    print("KERNEL_OK")
</pallas_src>

<mosaic_0001>
module attributes {stable_mosaic.version = 11 : i64} {
  func.func @_dice_kernel(%arg0: i32, %arg1: i32, %arg2: memref<8x256xf32, #tpu.memory_space<vmem>>, %arg3: memref<8x256xf32, #tpu.memory_space<vmem>>, %arg4: memref<8x1xf32, #tpu.memory_space<vmem>>, %arg5: memref<8x1xf32, #tpu.memory_space<vmem>>, %arg6: memref<8x1xf32, #tpu.memory_space<vmem>>) attributes {dimension_semantics = [#tpu.dimension_semantics<parallel>, #tpu.dimension_semantics<arbitrary>], iteration_bounds = array<i64: 1, 1>, scalar_prefetch = 0 : i64, scratch_operands = 2 : i64, tpu.core_type = #tpu.core_type<tc>, window_params = [{transform_indices = @transform_0, window_bounds = array<i64: 8, 256>}, {transform_indices = @transform_1, window_bounds = array<i64: 8, 256>}, {transform_indices = @transform_2, window_bounds = array<i64: 8, 1>}]} {
    %c0_i32 = arith.constant 0 : i32
    %0 = arith.cmpi eq, %arg1, %c0_i32 : i32
    %1 = arith.extui %0 : i1 to i32
    %c0_i32_0 = arith.constant 0 : i32
    %2 = arith.cmpi ne, %1, %c0_i32_0 : i32
    scf.if %2 {
      %cst_15 = arith.constant 0.000000e+00 : f32
      %22 = vector.broadcast %cst_15 : f32 to vector<8x1xf32>
      %c0_16 = arith.constant 0 : index
      %c0_17 = arith.constant 0 : index
      %23 = vector.load %arg5[%c0_16, %c0_17] : memref<8x1xf32, #tpu.memory_space<vmem>>, vector<8x1xf32>
      tpu.vector_store %arg5[%c0_16, %c0_17], %22 {strides = array<i32>} : memref<8x1xf32, #tpu.memory_space<vmem>>, vector<8x1xf32>,
      %cst_18 = arith.constant 0.000000e+00 : f32
      %24 = vector.broadcast %cst_18 : f32 to vector<8x1xf32>
      %c0_19 = arith.constant 0 : index
      %c0_20 = arith.constant 0 : index
      %25 = vector.load %arg6[%c0_19, %c0_20] : memref<8x1xf32, #tpu.memory_space<vmem>>, vector<8x1xf32>
      tpu.vector_store %arg6[%c0_19, %c0_20], %24 {strides = array<i32>} : memref<8x1xf32, #tpu.memory_space<vmem>>, vector<8x1xf32>,
    } else {
    }
    %c0 = arith.constant 0 : index
    %c0_1 = arith.constant 0 : index
    %3 = vector.load %arg2[%c0, %c0_1] : memref<8x256xf32, #tpu.memory_space<vmem>>, vector<8x256xf32>
    %c0_2 = arith.constant 0 : index
    %c0_3 = arith.constant 0 : index
    %4 = vector.load %arg3[%c0_2, %c0_3] : memref<8x256xf32, #tpu.memory_space<vmem>>, vector<8x256xf32>
    %c0_4 = arith.constant 0 : index
    %c0_5 = arith.constant 0 : index
    %5 = vector.load %arg5[%c0_4, %c0_5] : memref<8x1xf32, #tpu.memory_space<vmem>>, vector<8x1xf32>
    %6 = arith.mulf %4, %3 : vector<8x256xf32>
    %cst = arith.constant dense<0.000000e+00> : vector<8xf32>
    %7 = vector.multi_reduction <add>, %6, %cst [1] : vector<8x256xf32> to vector<8xf32>
    %8 = vector.shape_cast %7 : vector<8xf32> to vector<8x1xf32>
    %9 = arith.addf %5, %8 : vector<8x1xf32>
    %c0_6 = arith.constant 0 : index
    %c0_7 = arith.constant 0 : index
    %10 = vector.load %arg5[%c0_6, %c0_7] : memref<8x1xf32, #tpu.memory_space<vmem>>, vector<8x1xf32>
    tpu.vector_store %arg5[%c0_6, %c0_7], %9 {strides = array<i32>} : memref<8x1xf32, #tpu.memory_space<vmem>>, vector<8x1xf32>,
    %c0_8 = arith.constant 0 : index
    %c0_9 = arith.constant 0 : index
    %11 = vector.load %arg6[%c0_8, %c0_9] : memref<8x1xf32, #tpu.memory_space<vmem>>, vector<8x1xf32>
    %12 = arith.mulf %4, %4 : vector<8x256xf32>
    %13 = arith.mulf %3, %3 : vector<8x256xf32>
    %14 = arith.addf %12, %13 : vector<8x256xf32>
    %cst_10 = arith.constant dense<0.000000e+00> : vector<8xf32>
    %15 = vector.multi_reduction <add>, %14, %cst_10 [1] : vector<8x256xf32> to vector<8xf32>
    %16 = vector.shape_cast %15 : vector<8xf32> to vector<8x1xf32>
    %17 = arith.addf %11, %16 : vector<8x1xf32>
    %c0_11 = arith.constant 0 : index
    %c0_12 = arith.constant 0 : index
    %18 = vector.load %arg6[%c0_11, %c0_12] : memref<8x1xf32, #tpu.memory_space<vmem>>, vector<8x1xf32>
    tpu.vector_store %arg6[%c0_11, %c0_12], %17 {strides = array<i32>} : memref<8x1xf32, #tpu.memory_space<vmem>>, vector<8x1xf32>,
    %c0_i32_13 = arith.constant 0 : i32
    %19 = arith.cmpi eq, %arg1, %c0_i32_13 : i32
    %20 = arith.extui %19 : i1 to i32
    %c0_i32_14 = arith.constant 0 : i32
    %21 = arith.cmpi ne, %20, %c0_i32_14 : i32
    scf.if %21 {
      %c0_15 = arith.constant 0 : index
      %c0_16 = arith.constant 0 : index
      %22 = vector.load %arg5[%c0_15, %c0_16] : memref<8x1xf32, #tpu.memory_space<vmem>>, vector<8x1xf32>
      %cst_17 = arith.constant 2.000000e+00 : f32
      %23 = vector.broadcast %cst_17 : f32 to vector<8x1xf32>
      %24 = arith.mulf %23, %22 : vector<8x1xf32>
      %cst_18 = arith.constant 9.99999997E-7 : f32
      %25 = vector.broadcast %cst_18 : f32 to vector<8x1xf32>
      %26 = arith.addf %24, %25 : vector<8x1xf32>
      %c0_19 = arith.constant 0 : index
      %c0_20 = arith.constant 0 : index
      %27 = vector.load %arg6[%c0_19, %c0_20] : memref<8x1xf32, #tpu.memory_space<vmem>>, vector<8x1xf32>
      %cst_21 = arith.constant 9.99999997E-7 : f32
      %28 = vector.broadcast %cst_21 : f32 to vector<8x1xf32>
      %29 = arith.addf %27, %28 : vector<8x1xf32>
      %30 = arith.divf %26, %29 : vector<8x1xf32>
      %c0_22 = arith.constant 0 : index
      %c0_23 = arith.constant 0 : index
      %31 = vector.load %arg4[%c0_22, %c0_23] : memref<8x1xf32, #tpu.memory_space<vmem>>, vector<8x1xf32>
      tpu.vector_store %arg4[%c0_22, %c0_23], %30 {strides = array<i32>} : memref<8x1xf32, #tpu.memory_space<vmem>>, vector<8x1xf32>,
    } else {
    }
    return
  }
  func.func @transform_0(%arg0: i32, %arg1: i32) -> (i32, i32) {
    %c0_i32 = arith.constant 0 : i32
    return %arg0, %arg1 : i32, i32
  }
  func.func @transform_1(%arg0: i32, %arg1: i32) -> (i32, i32) {
    %c0_i32 = arith.constant 0 : i32
    return %arg0, %arg1 : i32, i32
  }
  func.func @transform_2(%arg0: i32, %arg1: i32) -> (i32, i32) {
    %c0_i32 = arith.constant 0 : i32
    %c0_i32_0 = arith.constant 0 : i32
    return %arg0, %c0_i32 : i32, i32
  }
}

</mosaic_0001>

<bundles_post_ra>
// kernel: tpu_custom_call.1
= control target key start
LH: loop header
LB: loop body
LE: loop exit
PB: predicated region body
PF: predicated region fallthrough
CT: control target
= control target key end

     0   :  { %7 = vsyncpa [#allocation5], 0  ;;  %s187_s0 = inlined_call_operand.hbm [shape: f32[8,256], index: 0, kind: input, shape index: {}]   ;;  %s188_s1 = inlined_call_operand.hbm [shape: f32[8,256], index: 1, kind: input, shape index: {}]   ;;  %s189_s2 = inlined_call_operand.vmem [shape: f32[8,1], index: 2, kind: output, shape index: {}]  }
   0x1   :  { %8 = vsyncpa [#allocation7], 0  ;;  %s137_s9 = smov [#allocation4]   ;;  %s138_s11 = smov [#allocation6]  }
   0x2   :  { %s15_s10 = sshll.u32 %s137_s9, 4  ;;  %s25_s12 = sshll.u32 %s138_s11, 4  ;;  %s16_s10 = int_to_ptr.vmem [resolvable:$true] %s15_s10  ;;  %s26_s12 = int_to_ptr.vmem [resolvable:$true] %s25_s12 }
   0x3   :  { %s89_s15 = scalar_lea.hbm %s187_s0, 256 }
   0x4   :  { %p90_p0 = scmp.ne.s32.totalorder %s187_s0, %s89_s15  ;;  %p93_p1 = scmp.lt.u32.totalorder %s89_s15, %s187_s0 }
   0x6   :  { %p95_p2 = pnand %p93_p1, %p90_p0 }
   0x8   :  { %98 = shalt.err (!%p95_p2)
}
   0x9   :  { %s99_s20 = scalar_lea.vmem %s16_s10, 256  ;;  %p104_p4 = scmp.lt.s32.totalorder %s16_s10, %s16_s10 }
   0xa   :  { %p100_p3 = scmp.ne.s32.totalorder %s16_s10, %s99_s20  ;;  %p105_p5 = scmp.lt.s32.totalorder %s99_s20, %s99_s20 }
   0xc   :  { %p106_p6 = por %p105_p5, %p104_p4 }
   0xe   :  { %p107_p7 = pnand %p106_p6, %p100_p3 }
  0x10   :  { %110 = shalt.err (!%p107_p7)
}
  0x11   :  { %18 = dma.hbm_to_vmem [thread:$0]  %s187_s0, 256, %s16_s10, [#allocation5]  }
  0x12   :  { %s111_s25 = scalar_lea.hbm %s188_s1, 256 }
  0x13   :  { %p112_p8 = scmp.ne.s32.totalorder %s188_s1, %s111_s25  ;;  %p115_p9 = scmp.lt.u32.totalorder %s111_s25, %s188_s1 }
  0x15   :  { %p117_p10 = pnand %p115_p9, %p112_p8 }
  0x17   :  { %120 = shalt.err (!%p117_p10)
}
  0x18   :  { %s121_s30 = scalar_lea.vmem %s26_s12, 256  ;;  %p126_p12 = scmp.lt.s32.totalorder %s26_s12, %s26_s12 }
  0x19   :  { %p122_p11 = scmp.ne.s32.totalorder %s26_s12, %s121_s30  ;;  %p127_p13 = scmp.lt.s32.totalorder %s121_s30, %s121_s30 }
  0x1b   :  { %p128_p0 = por %p127_p13, %p126_p12 }
  0x1d   :  { %p129_p1 = pnand %p128_p0, %p122_p11 }
  0x1f   :  { %132 = shalt.err (!%p129_p1)
}
  0x20   :  { %28 = dma.hbm_to_vmem [thread:$0]  %s188_s1, 256, %s26_s12, [#allocation7]  }
  0x21   :  { %133 = dma.done.wait [#allocation5], 256  }
  0x22   :  { %134 = vsyncadd [#allocation5], 4294967040 }
  0x23   :  { %135 = dma.done.wait [#allocation7], 256  }
  0x24   :  { %136 = vsyncadd [#allocation7], 4294967040  ;;  %vm39_vm0 = vcmask 7168   ;;  %v139_v0 = vmov 0.0   ;;  %v42_v1 = vld [vmem:[#allocation4] sm:$0xff]  ;;  %v43_v2 = vld [vmem:[#allocation4 + $0x8] sm:$0xff] }
  0x25   :  { %41 = vst.msk [vmem:[#allocation3] sm:$0xff] %vm39_vm0, %v139_v0  ;;  %40 = vst.msk [vmem:[#allocation2] sm:$0xff] %vm39_vm0, %v139_v0  ;;  %v44_v3 = vld [vmem:[#allocation6] sm:$0xff]  ;;  %v45_v4 = vld [vmem:[#allocation6 + $0x8] sm:$0xff]  ;;  %v58_v6 = vmul.f32 %v42_v1, %v42_v1  ;;  %v59_v7 = vmul.f32 %v43_v2, %v43_v2 }
  0x26   :  { %v56_v5 = vmul.f32 %v44_v3, %v44_v3  ;;  %v57_v8 = vmul.f32 %v45_v4, %v45_v4  ;;  %v47_v11 = vmul.f32 %v44_v3, %v42_v1  ;;  %v48_v12 = vmul.f32 %v45_v4, %v43_v2 }
  0x28   :  { %v60_v9 = vadd.f32 %v58_v6, %v56_v5  ;;  %v61_v10 = vadd.f32 %v59_v7, %v57_v8  ;;  %v49_v14 = vadd.f32 %v48_v12, %v47_v11 }
  0x2a   :  { %v62_v13 = vadd.f32 %v61_v10, %v60_v9 }
  0x2c   :  { %63 = vadd.xlane.f32.xlu0 %v62_v13  ;;  %v55_v15 = vld [vmem:[#allocation3] sm:$0xff]  ;;  %v46_v18 = vld [vmem:[#allocation2] sm:$0xff] }
  0x30   :  { %50 = vadd.xlane.f32.xlu0 %v49_v14 }
  0xb9   :  { %v64_v16 = vpop.xlane.xlu0 %63 }
  0xba   :  { %v65_v17 = vadd.f32 %v64_v16, %v55_v15 }
  0xbc   :  { %66 = vst.msk [vmem:[#allocation3] sm:$0xff] %vm39_vm0, %v65_v17 }
  0xbd   :  { %v51_v19 = vpop.xlane.xlu0 %50 }
  0xbe   :  { %v52_v20 = vadd.f32 %v51_v19, %v46_v18 }
  0xc0   :  { %54 = vst.msk [vmem:[#allocation2] sm:$0xff] %vm39_vm0, %v52_v20 }
  0xc3   :  { %v73_v21 = vld [vmem:[#allocation3] sm:$0xff] }
  0xc4   :  { %v74_v22 = vadd.f32 1e-06, %v73_v21 }
  0xc6   :  { %87 = vrcp.f32 %v74_v22 }
  0xc7   :  { %v70_v23 = vld [vmem:[#allocation2] sm:$0xff] }
  0xc8   :  { %v71_v24 = vmul.f32 2.0, %v70_v23 }
  0xca   :  { %v72_v25 = vadd.f32 1e-06, %v71_v24 }
  0xd0   :  { %v88_v26 = vpop.eup %87 }
  0xd1   :  { %v76_v27 = vmul.f32 %v88_v26, %v72_v25 }
  0xd3   :  { %77 = vst.msk [vmem:[%s189_s2] sm:$0xff] %vm39_vm0, %v76_v27 }
  0xd4   :  { %82 = vsyncpa [#allocation5], 1 }
  0xd5   :  { %83 = vsyncpa [#allocation7], 1 }

</bundles_post_ra>
